<compile_context>
chip_gen: v7x
topology: tpu7x:2x2x1
jax: 0.10.0
libtpu: 0.0.40
codegen_flags: <defaults>
</compile_context>

<pallas_src>
import math
import functools

import jax
import jax.numpy as jnp
from jax import lax
from jax.experimental import pallas as pl
from jax.experimental.pallas import tpu as pltpu

BLOCK_SIZE = 128   # max context length (size of the relative-position table)
N_EMBD = 144
DROPOUT = 0.1      # TODO(synk): dropout omitted — eval-mode identity (stochastic in training)

# MXU-operand / inter-kernel activation dtype.  bf16 runs the MXU at full rate
# on v5e/v6e/v7x and halves DMA/VMEM bytes; accumulation stays float32 via
# preferred_element_type.  Set to jnp.float32 for bit-faithful comparisons.
_MXU_DTYPE = jnp.bfloat16


def _lane_left_rotate(x, amt, size):
    """Left-rotate the last (lane) axis by static `amt`:
    out[..., c] = x[..., (c + amt) % size]."""
    if size % 128 == 0:
        # lane-native dim: XLU rotate (free slot).  pltpu.roll follows
        # jnp.roll semantics (out[c] = x[(c - shift) % size]), so a left
        # rotation by `amt` is shift = size - amt (shift must be >= 0).
        return pltpu.roll(x, size - amt, x.ndim - 1)
    # sub-128 lane dim: static slice + concat (always lowers cleanly).
    return jnp.concatenate([x[..., amt:], x[..., :amt]], axis=-1)


# ------------------------- Pallas kernels ---------------------------------

def _qkv_proj_kernel(x_ref, w_ref, q_ref, k_ref, v_ref):
    # x: (tm, C) @ w: (C, 3*proj); x streamed once, one MXU matmul, then the
    # 96-wide result is split into three lane-contiguous outputs in-kernel.
    proj = q_ref.shape[-1]
    out = jnp.dot(x_ref[...].astype(_MXU_DTYPE), w_ref[...].astype(_MXU_DTYPE),
                  preferred_element_type=jnp.float32)            # (tm, 3*proj)
    q_ref[...] = out[:, :proj].astype(q_ref.dtype)
    k_ref[...] = out[:, proj:2 * proj].astype(k_ref.dtype)
    v_ref[...] = out[:, 2 * proj:].astype(v_ref.dtype)


def pallas_qkv_proj(x2d, w_qkv, proj):
    """(M, C) @ (C, 3*proj) -> three (M, proj) outputs (q, k, v).

    Separate outputs make the downstream (B, nh, T, hs) view a free reshape —
    no strided HBM->HBM slices between the two pallas_calls."""
    M, K = x2d.shape
    N = w_qkv.shape[1]
    tm = min(M, 256)                      # row tile; ragged tail handled by Pallas
    out_sd = jax.ShapeDtypeStruct((M, proj), _MXU_DTYPE)
    out_spec = pl.BlockSpec((tm, proj), lambda i: (i, 0))
    return pl.pallas_call(
        _qkv_proj_kernel,
        out_shape=(out_sd, out_sd, out_sd),
        grid=(pl.cdiv(M, tm),),
        in_specs=[pl.BlockSpec((tm, K), lambda i: (i, 0)),
                  pl.BlockSpec((K, N), lambda i: (0, 0))],
        out_specs=(out_spec, out_spec, out_spec),
        compiler_params=pltpu.CompilerParams(
            dimension_semantics=("parallel",)),
    )(x2d, w_qkv)


def _rel_attn_kernel(q_ref, k_ref, v_ref, er_ref, wp_ref, bp_ref, o_ref):
    # q/k/v: (Bb, nh, T, hs); er: (T, hs); wp: (nh*hs, C); bp: (1, C)
    # o: (Bb, T, C)
    Bb, nh, T, hs = q_ref.shape
    C = o_ref.shape[-1]
    G = Bb * nh

    # flatten (batch, head) into one MXU batch axis (leading-dim merge: free)
    q = q_ref[...].reshape(G, T, hs).astype(_MXU_DTYPE)
    k = k_ref[...].reshape(G, T, hs)
    v = v_ref[...].reshape(G, T, hs).astype(_MXU_DTYPE)

    # ---- content + relative scores: ONE fused batched MXU matmul -----------
    # fold 1/sqrt(hs) into k (content term scaled, relative term un-scaled,
    # exactly as in the reference); j axis = [k_scaled | reversed rel table].
    scale = 1.0 / math.sqrt(hs)
    k_scaled = k.astype(jnp.float32) * scale                     # (G, T, hs)
    er = jnp.broadcast_to(er_ref[...][None], (G, T, hs))         # f32
    kcat = jnp.concatenate([k_scaled, er], axis=1).astype(_MXU_DTYPE)  # (G, 2T, hs)
    s_all = jnp.einsum('gid,gjd->gij', q, kcat,
                       preferred_element_type=jnp.float32)       # (G, T, 2T)
    scores = s_all[:, :, :T]        # q @ k^T / sqrt(hs)
    s_rev = s_all[:, :, T:]         # s_rev[g,i,c] = q[g,i] . E[BLOCK + T - 2 - c]

    # ---- skew ----------------------------------------------------------------
    # rel[g,i,j] = q[g,i] . E[(i-j)+BLOCK-1] = s_rev[g,i,(j + T-1-i) mod T]
    # i.e. left-rotate row i by (T-1-i): exact log2(T)-step barrel shifter.
    row = lax.broadcasted_iota(jnp.int32, (T, T), 0)
    col = lax.broadcasted_iota(jnp.int32, (T, T), 1)
    shift = (T - 1) - lax.broadcasted_iota(jnp.int32, (T, 1), 0)   # per-row amount
    rel = s_rev
    bit, amt = 0, 1
    while amt < T:
        rolled = _lane_left_rotate(rel, amt, T)
        rel = jnp.where(((shift >> bit) & 1) == 1, rolled, rel)
        bit, amt = bit + 1, amt << 1

    # ---- causal mask + softmax -----------------------------------------------
    # mask applied to (content + rel) jointly: the wrapped entries of `rel`
    # only ever land at j > i and are discarded here, exactly as the reference
    # masks its own j > i relative scores.  every row keeps j == i, so a fully
    # masked row (max = -inf -> NaN) cannot occur.
    masked = jnp.where(col <= row, scores + rel, -jnp.inf)
    m = jnp.max(masked, axis=-1, keepdims=True)
    e = jnp.exp(masked - m)
    p = e * pl.reciprocal(jnp.sum(e, axis=-1, keepdims=True), approx=True)
    # TODO(synk): dropout on the attention weights omitted (eval-mode identity)

    # ---- weighted values ------------------------------------------------------
    ctx = jnp.einsum('gij,gjd->gid', p.astype(_MXU_DTYPE), v,
                     preferred_element_type=jnp.float32)         # (G, T, hs)

    # ---- head merge + fused output projection ---------------------------------
    # context.transpose(1, 2).view(B, T, nh*hs) realized as a static lane
    # concat (cheap layout work), then ONE MXU matmul with K = nh*hs.
    ctx = ctx.reshape(Bb, nh, T, hs)
    merged = jnp.concatenate([ctx[:, h] for h in range(nh)], axis=-1)  # (Bb,T,nh*hs)
    merged = merged.reshape(Bb * T, nh * hs).astype(_MXU_DTYPE)
    out = jnp.dot(merged, wp_ref[...].astype(_MXU_DTYPE),
                  preferred_element_type=jnp.float32)            # (Bb*T, C)
    out = out + bp_ref[...]
    o_ref[...] = out.reshape(Bb, T, C).astype(o_ref.dtype)


def _pick_block_b(B, max_bb=8):
    """Largest divisor of B (<= max_bb) that keeps the grid length >= 2 so the
    batch axis can still be split across v7x's two TensorCores."""
    best = 1
    for bb in range(1, min(B, max_bb) + 1):
        if B % bb == 0 and B // bb >= 2:
            best = bb
    return best


def pallas_rel_attention(q, k, v, e_rev, w_proj, b_proj, *, out_dtype=jnp.float32):
    """q,k,v: (B, nh, T, hs); e_rev: (T, hs); w_proj: (nh*hs, C); b_proj: (1, C)
    -> (B, T, C): attention + head merge + output projection fused."""
    B, nh, T, hs = q.shape
    C = w_proj.shape[-1]
    Bb = _pick_block_b(B)
    qkv_spec = pl.BlockSpec((Bb, nh, T, hs), lambda b: (b, 0, 0, 0))
    return pl.pallas_call(
        _rel_attn_kernel,
        out_shape=jax.ShapeDtypeStruct((B, T, C), out_dtype),
        grid=(B // Bb,),
        in_specs=[qkv_spec, qkv_spec, qkv_spec,
                  pl.BlockSpec((T, hs), lambda b: (0, 0)),
                  pl.BlockSpec((nh * hs, C), lambda b: (0, 0)),
                  pl.BlockSpec((1, C), lambda b: (0, 0))],
        out_specs=pl.BlockSpec((Bb, T, C), lambda b: (b, 0, 0)),
        compiler_params=pltpu.CompilerParams(
            dimension_semantics=("parallel",)),   # v7x: batch across both TCs
    )(q, k, v, e_rev, w_proj, b_proj)


# ------------------------- parameters & wrapper ----------------------------

def init_params(key, num_heads, head_size):
    ks = jax.random.split(key, 6)
    proj = num_heads * head_size
    s = 0.02
    return {
        # stored as [in, out] (= PyTorch weight transposed)
        "w_q": s * jax.random.normal(ks[0], (N_EMBD, proj), jnp.float32),
        "w_k": s * jax.random.normal(ks[1], (N_EMBD, proj), jnp.float32),
        "w_v": s * jax.random.normal(ks[2], (N_EMBD, proj), jnp.float32),
        "rel_pos_emb": s * jax.random.normal(
            ks[3], (2 * BLOCK_SIZE - 1, head_size), jnp.float32),
        "w_proj": s * jax.random.normal(ks[4], (proj, N_EMBD), jnp.float32),
        "b_proj": s * jax.random.normal(ks[5], (N_EMBD,), jnp.float32),
    }


def prepare_params(params):
    """One-time parameter prep hoisted out of the forward (per perf review)."""
    return {
        # fused Q|K|V weight for the single projection matmul
        "w_qkv": jnp.concatenate(
            [params["w_q"], params["w_k"], params["w_v"]], axis=1),  # (C, 3*proj)
        # pre-flipped relative table so the per-call slice is contiguous:
        # rev[i] = rel_pos_emb[2*BLOCK_SIZE - 2 - i]
        "rel_pos_emb_rev": params["rel_pos_emb"][::-1],
        "w_proj": params["w_proj"],                                  # (proj, C)
        "b_proj": params["b_proj"].reshape(1, -1),                   # (1, C)
    }


def relative_mha_forward(prepared, x, *, num_heads, head_size):
    B, T, C = x.shape
    assert C == N_EMBD and T <= BLOCK_SIZE

    # fused bias-free Q|K|V projection (x streamed once); three separate
    # lane-contiguous outputs so the head split below is a free reshape.
    q2d, k2d, v2d = pallas_qkv_proj(x.reshape(B * T, C), prepared["w_qkv"],
                                    num_heads * head_size)

    # exact reproduction of PyTorch's straight .view(B, num_heads, T, head_size)
    # (row-major reinterpretation, NOT a per-channel head transpose).
    q = q2d.reshape(B, num_heads, T, head_size)
    k = k2d.reshape(B, num_heads, T, head_size)
    v = v2d.reshape(B, num_heads, T, head_size)

    # reversed causal slice of the pre-flipped table (contiguous slice):
    # e_rev[c] = rel_pos_emb[BLOCK_SIZE + T - 2 - c]
    e_rev = prepared["rel_pos_emb_rev"][BLOCK_SIZE - T:BLOCK_SIZE]

    # fused attention + head-merge + output projection
    return pallas_rel_attention(q, k, v, e_rev, prepared["w_proj"],
                                prepared["b_proj"], out_dtype=x.dtype)


# ------------------------- pure-jnp reference (for self-check) -------------

def reference_forward(params, x, num_heads, head_size):
    B, T, C = x.shape
    proj = num_heads * head_size
    x2 = x.reshape(B * T, C)
    q = (x2 @ params["w_q"]).reshape(B, num_heads, T, head_size)
    k = (x2 @ params["w_k"]).reshape(B, num_heads, T, head_size)
    v = (x2 @ params["w_v"]).reshape(B, num_heads, T, head_size)
    pos = jnp.arange(T)
    relp = pos[:, None] - pos[None, :] + (BLOCK_SIZE - 1)
    rel_emb = params["rel_pos_emb"][relp]                         # (T, T, hs)
    scores = jnp.einsum('bhid,bhjd->bhij', q, k) * (1.0 / math.sqrt(head_size))
    scores = scores + jnp.einsum('bhid,ijd->bhij', q, rel_emb)
    mask = jnp.tril(jnp.ones((T, T), dtype=bool))
    scores = jnp.where(mask[None, None], scores, -jnp.inf)
    p = jax.nn.softmax(scores, axis=-1)
    ctx = jnp.einsum('bhij,bhjd->bhid', p, v)
    merged = jnp.transpose(ctx, (0, 2, 1, 3)).reshape(B, T, proj)
    return merged @ params["w_proj"] + params["b_proj"]


# ------------------------------ main ---------------------------------------

if __name__ == "__main__":
    key = jax.random.PRNGKey(0)
    k_param, k_x = jax.random.split(key)

    B, T = 2, 8
    num_heads, head_size = 2, 16

    params = init_params(k_param, num_heads, head_size)
    prepared = prepare_params(params)
    x = jax.random.normal(k_x, (B, T, N_EMBD), jnp.float32)

    fwd = jax.jit(functools.partial(relative_mha_forward,
                                    num_heads=num_heads, head_size=head_size))
    out = jax.block_until_ready(fwd(prepared, x))

    assert out.shape == (B, T, N_EMBD)
    assert bool(jnp.all(jnp.isfinite(out)))

    # numerical self-check against a pure-jnp float32 mirror of the PyTorch
    # module.  Tolerance relaxed vs f32 because MXU operands / intermediate
    # q,k,v are bf16 and the softmax uses the approx EUP reciprocal.
    ref = reference_forward(params, x, num_heads, head_size)
    err = float(jnp.max(jnp.abs(out - ref)))
    assert err < 5e-3, f"max abs error vs reference: {err}"

    print("KERNEL_OK")
</pallas_src>

<mosaic_0001>
module attributes {stable_mosaic.version = 11 : i64} {
  func.func @_qkv_proj_kernel(%arg0: i32, %arg1: memref<16x144xf32, #tpu.memory_space<vmem>>, %arg2: memref<144x96xf32, #tpu.memory_space<vmem>>, %arg3: memref<16x32xbf16, #tpu.memory_space<vmem>>, %arg4: memref<16x32xbf16, #tpu.memory_space<vmem>>, %arg5: memref<16x32xbf16, #tpu.memory_space<vmem>>) attributes {dimension_semantics = [#tpu.dimension_semantics<parallel>], iteration_bounds = array<i64: 1>, scalar_prefetch = 0 : i64, scratch_operands = 0 : i64, tpu.core_type = #tpu.core_type<tc>, window_params = [{transform_indices = @transform_0, window_bounds = array<i64: 16, 144>}, {pipeline_mode = #tpu.pipeline_mode<synchronous>, transform_indices = @transform_1, window_bounds = array<i64: 144, 96>}, {transform_indices = @transform_2, window_bounds = array<i64: 16, 32>}, {transform_indices = @transform_3, window_bounds = array<i64: 16, 32>}, {transform_indices = @transform_4, window_bounds = array<i64: 16, 32>}]} {
    %c0 = arith.constant 0 : index
    %c0_0 = arith.constant 0 : index
    %0 = vector.load %arg1[%c0, %c0_0] : memref<16x144xf32, #tpu.memory_space<vmem>>, vector<16x144xf32>
    %1 = arith.truncf %0 : vector<16x144xf32> to vector<16x144xbf16>
    %c0_1 = arith.constant 0 : index
    %c0_2 = arith.constant 0 : index
    %2 = vector.load %arg2[%c0_1, %c0_2] : memref<144x96xf32, #tpu.memory_space<vmem>>, vector<144x96xf32>
    %3 = arith.truncf %2 : vector<144x96xf32> to vector<144x96xbf16>
    %cst = arith.constant dense<0.000000e+00> : vector<16x96xf32>
    %4 = tpu.matmul %1, %3, %cst {dimension_numbers = #tpu.dot_dimension_numbers<[1], [0], [0], [1], [0, 0, 1, 1], [], []>} : vector<16x144xbf16>, vector<144x96xbf16>, vector<16x96xf32> -> vector<16x96xf32>
    %5 = vector.extract_strided_slice %4 {offsets = [0, 0], sizes = [16, 32], strides = [1, 1]} : vector<16x96xf32> to vector<16x32xf32>
    %6 = arith.truncf %5 : vector<16x32xf32> to vector<16x32xbf16>
    %c0_3 = arith.constant 0 : index
    %c0_4 = arith.constant 0 : index
    %7 = vector.load %arg3[%c0_3, %c0_4] : memref<16x32xbf16, #tpu.memory_space<vmem>>, vector<16x32xbf16>
    tpu.vector_store %arg3[%c0_3, %c0_4], %6 {strides = array<i32>} : memref<16x32xbf16, #tpu.memory_space<vmem>>, vector<16x32xbf16>,
    %8 = vector.extract_strided_slice %4 {offsets = [0, 32], sizes = [16, 32], strides = [1, 1]} : vector<16x96xf32> to vector<16x32xf32>
    %9 = arith.truncf %8 : vector<16x32xf32> to vector<16x32xbf16>
    %c0_5 = arith.constant 0 : index
    %c0_6 = arith.constant 0 : index
    %10 = vector.load %arg4[%c0_5, %c0_6] : memref<16x32xbf16, #tpu.memory_space<vmem>>, vector<16x32xbf16>
    tpu.vector_store %arg4[%c0_5, %c0_6], %9 {strides = array<i32>} : memref<16x32xbf16, #tpu.memory_space<vmem>>, vector<16x32xbf16>,
    %11 = vector.extract_strided_slice %4 {offsets = [0, 64], sizes = [16, 32], strides = [1, 1]} : vector<16x96xf32> to vector<16x32xf32>
    %12 = arith.truncf %11 : vector<16x32xf32> to vector<16x32xbf16>
    %c0_7 = arith.constant 0 : index
    %c0_8 = arith.constant 0 : index
    %13 = vector.load %arg5[%c0_7, %c0_8] : memref<16x32xbf16, #tpu.memory_space<vmem>>, vector<16x32xbf16>
    tpu.vector_store %arg5[%c0_7, %c0_8], %12 {strides = array<i32>} : memref<16x32xbf16, #tpu.memory_space<vmem>>, vector<16x32xbf16>,
    return
  }
  func.func @transform_0(%arg0: i32) -> (i32, i32) {
    %c0_i32 = arith.constant 0 : i32
    %c0_i32_0 = arith.constant 0 : i32
    return %arg0, %c0_i32 : i32, i32
  }
  func.func @transform_1(%arg0: i32) -> (i32, i32) {
    %c0_i32 = arith.constant 0 : i32
    %c0_i32_0 = arith.constant 0 : i32
    %c0_i32_1 = arith.constant 0 : i32
    return %c0_i32, %c0_i32_0 : i32, i32
  }
  func.func @transform_2(%arg0: i32) -> (i32, i32) {
    %c0_i32 = arith.constant 0 : i32
    %c0_i32_0 = arith.constant 0 : i32
    return %arg0, %c0_i32 : i32, i32
  }
  func.func @transform_3(%arg0: i32) -> (i32, i32) {
    %c0_i32 = arith.constant 0 : i32
    %c0_i32_0 = arith.constant 0 : i32
    return %arg0, %c0_i32 : i32, i32
  }
  func.func @transform_4(%arg0: i32) -> (i32, i32) {
    %c0_i32 = arith.constant 0 : i32
    %c0_i32_0 = arith.constant 0 : i32
    return %arg0, %c0_i32 : i32, i32
  }
}

module attributes {stable_mosaic.version = 11 : i64} {
  func.func @_rel_attn_kernel(%arg0: i32, %arg1: memref<1x2x8x16xbf16, #tpu.memory_space<vmem>>, %arg2: memref<1x2x8x16xbf16, #tpu.memory_space<vmem>>, %arg3: memref<1x2x8x16xbf16, #tpu.memory_space<vmem>>, %arg4: memref<8x16xf32, #tpu.memory_space<vmem>>, %arg5: memref<32x144xf32, #tpu.memory_space<vmem>>, %arg6: memref<1x144xf32, #tpu.memory_space<vmem>>, %arg7: memref<1x8x144xf32, #tpu.memory_space<vmem>>) attributes {dimension_semantics = [#tpu.dimension_semantics<parallel>], iteration_bounds = array<i64: 2>, scalar_prefetch = 0 : i64, scratch_operands = 0 : i64, tpu.core_type = #tpu.core_type<tc>, window_params = [{transform_indices = @transform_0, window_bounds = array<i64: 1, 2, 8, 16>}, {transform_indices = @transform_1, window_bounds = array<i64: 1, 2, 8, 16>}, {transform_indices = @transform_2, window_bounds = array<i64: 1, 2, 8, 16>}, {pipeline_mode = #tpu.pipeline_mode<synchronous>, transform_indices = @transform_3, window_bounds = array<i64: 8, 16>}, {pipeline_mode = #tpu.pipeline_mode<synchronous>, transform_indices = @transform_4, window_bounds = array<i64: 32, 144>}, {pipeline_mode = #tpu.pipeline_mode<synchronous>, transform_indices = @transform_5, window_bounds = array<i64: 1, 144>}, {transform_indices = @transform_6, window_bounds = array<i64: 1, 8, 144>}]} {
    %c0 = arith.constant 0 : index
    %c0_0 = arith.constant 0 : index
    %c0_1 = arith.constant 0 : index
    %c0_2 = arith.constant 0 : index
    %0 = vector.load %arg1[%c0, %c0_0, %c0_1, %c0_2] : memref<1x2x8x16xbf16, #tpu.memory_space<vmem>>, vector<1x2x8x16xbf16>
    %1 = vector.shape_cast %0 : vector<1x2x8x16xbf16> to vector<2x8x16xbf16>
    %c0_3 = arith.constant 0 : index
    %c0_4 = arith.constant 0 : index
    %c0_5 = arith.constant 0 : index
    %c0_6 = arith.constant 0 : index
    %2 = vector.load %arg2[%c0_3, %c0_4, %c0_5, %c0_6] : memref<1x2x8x16xbf16, #tpu.memory_space<vmem>>, vector<1x2x8x16xbf16>
    %3 = vector.shape_cast %2 : vector<1x2x8x16xbf16> to vector<2x8x16xbf16>
    %c0_7 = arith.constant 0 : index
    %c0_8 = arith.constant 0 : index
    %c0_9 = arith.constant 0 : index
    %c0_10 = arith.constant 0 : index
    %4 = vector.load %arg3[%c0_7, %c0_8, %c0_9, %c0_10] : memref<1x2x8x16xbf16, #tpu.memory_space<vmem>>, vector<1x2x8x16xbf16>
    %5 = vector.shape_cast %4 : vector<1x2x8x16xbf16> to vector<2x8x16xbf16>
    %6 = arith.extf %3 : vector<2x8x16xbf16> to vector<2x8x16xf32>
    %cst = arith.constant 2.500000e-01 : f32
    %7 = vector.broadcast %cst : f32 to vector<2x8x16xf32>
    %8 = arith.mulf %6, %7 : vector<2x8x16xf32>
    %c0_11 = arith.constant 0 : index
    %c0_12 = arith.constant 0 : index
    %9 = vector.load %arg4[%c0_11, %c0_12] : memref<8x16xf32, #tpu.memory_space<vmem>>, vector<8x16xf32>
    %10 = vector.shape_cast %9 : vector<8x16xf32> to vector<1x8x16xf32>
    %11 = vector.shape_cast %10 : vector<1x8x16xf32> to vector<1x8x16xf32>
    %12 = vector.broadcast %11 : vector<1x8x16xf32> to vector<2x8x16xf32>
    %13 = tpu.concatenate %8, %12 in 1 : vector<2x8x16xf32>, vector<2x8x16xf32> -> vector<2x16x16xf32>
    %14 = arith.truncf %13 : vector<2x16x16xf32> to vector<2x16x16xbf16>
    "tpu.trace_start"() <{level = 10 : i32, message = "gid,gjd->gij"}> : () -> ()
    %cst_13 = arith.constant dense<0.000000e+00> : vector<2x8x16xf32>
    %15 = tpu.matmul %1, %14, %cst_13 {dimension_numbers = #tpu.dot_dimension_numbers<[2], [2], [1], [1], [0, 0, 0, 1, 1, 1], [0], [0]>} : vector<2x8x16xbf16>, vector<2x16x16xbf16>, vector<2x8x16xf32> -> vector<2x8x16xf32>
    "tpu.trace_stop"() : () -> ()
    %16 = vector.extract_strided_slice %15 {offsets = [0, 0, 0], sizes = [2, 8, 8], strides = [1, 1, 1]} : vector<2x8x16xf32> to vector<2x8x8xf32>
    %17 = vector.extract_strided_slice %15 {offsets = [0, 0, 8], sizes = [2, 8, 8], strides = [1, 1, 1]} : vector<2x8x16xf32> to vector<2x8x8xf32>
    %18 = tpu.iota {dimensions = array<i32: 0>} : vector<8x8xi32>
    %19 = tpu.iota {dimensions = array<i32: 1>} : vector<8x8xi32>
    %20 = tpu.iota {dimensions = array<i32: 0>} : vector<8x1xi32>
    %c7_i32 = arith.constant 7 : i32
    %21 = vector.broadcast %c7_i32 : i32 to vector<8x1xi32>
    %22 = arith.subi %21, %20 : vector<8x1xi32>
    %23 = vector.extract_strided_slice %17 {offsets = [0, 0, 1], sizes = [2, 8, 7], strides = [1, 1, 1]} : vector<2x8x8xf32> to vector<2x8x7xf32>
    %24 = vector.extract_strided_slice %17 {offsets = [0, 0, 0], sizes = [2, 8, 1], strides = [1, 1, 1]} : vector<2x8x8xf32> to vector<2x8x1xf32>
    %25 = tpu.concatenate %23, %24 in 2 : vector<2x8x7xf32>, vector<2x8x1xf32> -> vector<2x8x8xf32>
    %c0_i32 = arith.constant 0 : i32
    %26 = vector.broadcast %c0_i32 : i32 to vector<8x1xi32>
    %27 = arith.shrsi %22, %26 : vector<8x1xi32>
    %c1_i32 = arith.constant 1 : i32
    %28 = vector.broadcast %c1_i32 : i32 to vector<8x1xi32>
    %29 = arith.andi %27, %28 : vector<8x1xi32>
    %c1_i32_14 = arith.constant 1 : i32
    %30 = vector.broadcast %c1_i32_14 : i32 to vector<8x1xi32>
    %31 = arith.cmpi eq, %29, %30 : vector<8x1xi32>
    %32 = vector.shape_cast %31 : vector<8x1xi1> to vector<1x8x1xi1>
    %33 = vector.broadcast %32 : vector<1x8x1xi1> to vector<2x8x8xi1>
    %34 = arith.select %33, %25, %17 : vector<2x8x8xi1>, vector<2x8x8xf32>
    %35 = vector.extract_strided_slice %34 {offsets = [0, 0, 2], sizes = [2, 8, 6], strides = [1, 1, 1]} : vector<2x8x8xf32> to vector<2x8x6xf32>
    %36 = vector.extract_strided_slice %34 {offsets = [0, 0, 0], sizes = [2, 8, 2], strides = [1, 1, 1]} : vector<2x8x8xf32> to vector<2x8x2xf32>
    %37 = tpu.concatenate %35, %36 in 2 : vector<2x8x6xf32>, vector<2x8x2xf32> -> vector<2x8x8xf32>
    %c1_i32_15 = arith.constant 1 : i32
    %38 = vector.broadcast %c1_i32_15 : i32 to vector<8x1xi32>
    %39 = arith.shrsi %22, %38 : vector<8x1xi32>
    %c1_i32_16 = arith.constant 1 : i32
    %40 = vector.broadcast %c1_i32_16 : i32 to vector<8x1xi32>
    %41 = arith.andi %39, %40 : vector<8x1xi32>
    %c1_i32_17 = arith.constant 1 : i32
    %42 = vector.broadcast %c1_i32_17 : i32 to vector<8x1xi32>
    %43 = arith.cmpi eq, %41, %42 : vector<8x1xi32>
    %44 = vector.shape_cast %43 : vector<8x1xi1> to vector<1x8x1xi1>
    %45 = vector.broadcast %44 : vector<1x8x1xi1> to vector<2x8x8xi1>
    %46 = arith.select %45, %37, %34 : vector<2x8x8xi1>, vector<2x8x8xf32>
    %47 = vector.extract_strided_slice %46 {offsets = [0, 0, 4], sizes = [2, 8, 4], strides = [1, 1, 1]} : vector<2x8x8xf32> to vector<2x8x4xf32>
    %48 = vector.extract_strided_slice %46 {offsets = [0, 0, 0], sizes = [2, 8, 4], strides = [1, 1, 1]} : vector<2x8x8xf32> to vector<2x8x4xf32>
    %49 = tpu.concatenate %47, %48 in 2 : vector<2x8x4xf32>, vector<2x8x4xf32> -> vector<2x8x8xf32>
    %c2_i32 = arith.constant 2 : i32
    %50 = vector.broadcast %c2_i32 : i32 to vector<8x1xi32>
    %51 = arith.shrsi %22, %50 : vector<8x1xi32>
    %c1_i32_18 = arith.constant 1 : i32
    %52 = vector.broadcast %c1_i32_18 : i32 to vector<8x1xi32>
    %53 = arith.andi %51, %52 : vector<8x1xi32>
    %c1_i32_19 = arith.constant 1 : i32
    %54 = vector.broadcast %c1_i32_19 : i32 to vector<8x1xi32>
    %55 = arith.cmpi eq, %53, %54 : vector<8x1xi32>
    %56 = vector.shape_cast %55 : vector<8x1xi1> to vector<1x8x1xi1>
    %57 = vector.broadcast %56 : vector<1x8x1xi1> to vector<2x8x8xi1>
    %58 = arith.select %57, %49, %46 : vector<2x8x8xi1>, vector<2x8x8xf32>
    %59 = arith.cmpi sle, %19, %18 : vector<8x8xi32>
    %60 = arith.addf %16, %58 : vector<2x8x8xf32>
    %cst_20 = arith.constant 0xFF800000 : f32
    %61 = vector.shape_cast %59 : vector<8x8xi1> to vector<1x8x8xi1>
    %62 = vector.broadcast %61 : vector<1x8x8xi1> to vector<2x8x8xi1>
    %63 = vector.broadcast %cst_20 : f32 to vector<2x8x8xf32>
    %64 = arith.select %62, %60, %63 : vector<2x8x8xi1>, vector<2x8x8xf32>
    %cst_21 = arith.constant dense<0xFF800000> : vector<2x8xf32>
    %65 = vector.multi_reduction <maximumf>, %64, %cst_21 [2] : vector<2x8x8xf32> to vector<2x8xf32>
    %66 = vector.shape_cast %65 : vector<2x8xf32> to vector<2x8x1xf32>
    %67 = vector.broadcast %66 : vector<2x8x1xf32> to vector<2x8x8xf32>
    %68 = arith.subf %64, %67 : vector<2x8x8xf32>
    %69 = math.exp %68 : vector<2x8x8xf32>
    %cst_22 = arith.constant dense<0.000000e+00> : vector<2x8xf32>
    %70 = vector.multi_reduction <add>, %69, %cst_22 [2] : vector<2x8x8xf32> to vector<2x8xf32>
    %71 = vector.shape_cast %70 : vector<2x8xf32> to vector<2x8x1xf32>
    %72 = tpu.reciprocal %71 {approx = true} : vector<2x8x1xf32> -> vector<2x8x1xf32>
    %73 = vector.broadcast %72 : vector<2x8x1xf32> to vector<2x8x8xf32>
    %74 = arith.mulf %69, %73 : vector<2x8x8xf32>
    %75 = arith.truncf %74 : vector<2x8x8xf32> to vector<2x8x8xbf16>
    "tpu.trace_start"() <{level = 10 : i32, message = "gij,gjd->gid"}> : () -> ()
    %cst_23 = arith.constant dense<0.000000e+00> : vector<2x8x16xf32>
    %76 = tpu.matmul %75, %5, %cst_23 {dimension_numbers = #tpu.dot_dimension_numbers<[2], [1], [1], [2], [0, 0, 0, 1, 1, 2], [0], [0]>} : vector<2x8x8xbf16>, vector<2x8x16xbf16>, vector<2x8x16xf32> -> vector<2x8x16xf32>
    "tpu.trace_stop"() : () -> ()
    %77 = vector.shape_cast %76 : vector<2x8x16xf32> to vector<1x2x8x16xf32>
    %78 = vector.extract_strided_slice %77 {offsets = [0, 0, 0, 0], sizes = [1, 1, 8, 16], strides = [1, 1, 1, 1]} : vector<1x2x8x16xf32> to vector<1x1x8x16xf32>
    %79 = vector.shape_cast %78 : vector<1x1x8x16xf32> to vector<1x8x16xf32>
    %80 = vector.extract_strided_slice %77 {offsets = [0, 1, 0, 0], sizes = [1, 1, 8, 16], strides = [1, 1, 1, 1]} : vector<1x2x8x16xf32> to vector<1x1x8x16xf32>
    %81 = vector.shape_cast %80 : vector<1x1x8x16xf32> to vector<1x8x16xf32>
    %82 = tpu.concatenate %79, %81 in 2 : vector<1x8x16xf32>, vector<1x8x16xf32> -> vector<1x8x32xf32>
    %83 = vector.shape_cast %82 : vector<1x8x32xf32> to vector<8x32xf32>
    %84 = arith.truncf %83 : vector<8x32xf32> to vector<8x32xbf16>
    %c0_24 = arith.constant 0 : index
    %c0_25 = arith.constant 0 : index
    %85 = vector.load %arg5[%c0_24, %c0_25] : memref<32x144xf32, #tpu.memory_space<vmem>>, vector<32x144xf32>
    %86 = arith.truncf %85 : vector<32x144xf32> to vector<32x144xbf16>
    %cst_26 = arith.constant dense<0.000000e+00> : vector<8x144xf32>
    %87 = tpu.matmul %84, %86, %cst_26 {dimension_numbers = #tpu.dot_dimension_numbers<[1], [0], [0], [1], [0, 0, 1, 1], [], []>} : vector<8x32xbf16>, vector<32x144xbf16>, vector<8x144xf32> -> vector<8x144xf32>
    %c0_27 = arith.constant 0 : index
    %c0_28 = arith.constant 0 : index
    %88 = vector.load %arg6[%c0_27, %c0_28] : memref<1x144xf32, #tpu.memory_space<vmem>>, vector<1x144xf32>
    %89 = vector.broadcast %88 : vector<1x144xf32> to vector<8x144xf32>
    %90 = arith.addf %87, %89 : vector<8x144xf32>
    %91 = vector.shape_cast %90 : vector<8x144xf32> to vector<1x8x144xf32>
    %c0_29 = arith.constant 0 : index
    %c0_30 = arith.constant 0 : index
    %c0_31 = arith.constant 0 : index
    %92 = vector.load %arg7[%c0_29, %c0_30, %c0_31] : memref<1x8x144xf32, #tpu.memory_space<vmem>>, vector<1x8x144xf32>
    tpu.vector_store %arg7[%c0_29, %c0_30, %c0_31], %91 {strides = array<i32>} : memref<1x8x144xf32, #tpu.memory_space<vmem>>, vector<1x8x144xf32>,
    return
  }
  func.func @transform_0(%arg0: i32) -> (i32, i32, i32, i32) {
    %c0_i32 = arith.constant 0 : i32
    %c0_i32_0 = arith.constant 0 : i32
    %c0_i32_1 = arith.constant 0 : i32
    %c0_i32_2 = arith.constant 0 : i32
    return %arg0, %c0_i32, %c0_i32_0, %c0_i32_1 : i32, i32, i32, i32
  }
  func.func @transform_1(%arg0: i32) -> (i32, i32, i32, i32) {
    %c0_i32 = arith.constant 0 : i32
    %c0_i32_0 = arith.constant 0 : i32
    %c0_i32_1 = arith.constant 0 : i32
    %c0_i32_2 = arith.constant 0 : i32
    return %arg0, %c0_i32, %c0_i32_0, %c0_i32_1 : i32, i32, i32, i32
  }
  func.func @transform_2(%arg0: i32) -> (i32, i32, i32, i32) {
    %c0_i32 = arith.constant 0 : i32
    %c0_i32_0 = arith.constant 0 : i32
    %c0_i32_1 = arith.constant 0 : i32
    %c0_i32_2 = arith.constant 0 : i32
    return %arg0, %c0_i32, %c0_i32_0, %c0_i32_1 : i32, i32, i32, i32
  }
  func.func @transform_3(%arg0: i32) -> (i32, i32) {
    %c0_i32 = arith.constant 0 : i32
    %c0_i32_0 = arith.constant 0 : i32
    %c0_i32_1 = arith.constant 0 : i32
    return %c0_i32, %c0_i32_0 : i32, i32
  }
  func.func @transform_4(%arg0: i32) -> (i32, i32) {
    %c0_i32 = arith.constant 0 : i32
    %c0_i32_0 = arith.constant 0 : i32
    %c0_i32_1 = arith.constant 0 : i32
    return %c0_i32, %c0_i32_0 : i32, i32
  }
  func.func @transform_5(%arg0: i32) -> (i32, i32) {
    %c0_i32 = arith.constant 0 : i32
    %c0_i32_0 = arith.constant 0 : i32
    %c0_i32_1 = arith.constant 0 : i32
    return %c0_i32, %c0_i32_0 : i32, i32
  }
  func.func @transform_6(%arg0: i32) -> (i32, i32, i32) {
    %c0_i32 = arith.constant 0 : i32
    %c0_i32_0 = arith.constant 0 : i32
    %c0_i32_1 = arith.constant 0 : i32
    return %arg0, %c0_i32, %c0_i32_0 : i32, i32, i32
  }
}

</mosaic_0001>

<bundles_post_ra>
// kernel: relative_mha_forward.2
= control target key start
LH: loop header
LB: loop body
LE: loop exit
PB: predicated region body
PF: predicated region fallthrough
CT: control target
= control target key end

     0   :  { %10 = vsyncpa [#allocation3], 0  ;;  %s182_s15 = smov [#allocation2]   ;;  %s261_s0 = inlined_call_operand.vmem [shape: f32[16,144], index: 0, kind: input, shape index: {}]   ;;  %s262_s1 = inlined_call_operand.hbm [shape: f32[144,96], index: 1, kind: input, shape index: {}]   ;;  %s263_s2 = inlined_call_operand.vmem [shape: bf16[16,32], index: 2, kind: output, shape index: {0}]   ;;  %s264_s3 = inlined_call_operand.vmem [shape: bf16[16,32], index: 3, kind: output, shape index: {1}]   ;;  %s265_s4 = inlined_call_operand.vmem [shape: bf16[16,32], index: 4, kind: output, shape index: {2}]  }
   0x1   :  { %s18_s16 = sshll.u32 %s182_s15, 4  ;;  %s158_s19 = scalar_lea.hbm %s262_s1, 2304  ;;  %s19_s16 = int_to_ptr.vmem [resolvable:$true] %s18_s16 }
   0x2   :  { %p159_p0 = scmp.ne.s32.totalorder %s262_s1, %s158_s19  ;;  %p162_p1 = scmp.lt.u32.totalorder %s158_s19, %s262_s1 }
   0x4   :  { %p164_p2 = pnand %p162_p1, %p159_p0 }
   0x6   :  { %167 = shalt.err (!%p164_p2)
}
   0x7   :  { %s168_s24 = scalar_lea.vmem %s19_s16, 2304  ;;  %p173_p4 = scmp.lt.s32.totalorder %s19_s16, %s19_s16 }
   0x8   :  { %p169_p3 = scmp.ne.s32.totalorder %s19_s16, %s168_s24  ;;  %p174_p5 = scmp.lt.s32.totalorder %s168_s24, %s168_s24 }
   0xa   :  { %p175_p6 = por %p174_p5, %p173_p4 }
   0xc   :  { %p176_p7 = pnand %p175_p6, %p169_p3 }
   0xe   :  { %179 = shalt.err (!%p176_p7)
}
   0xf   :  { %s183_s25 = smov 128   ;;  %s184_s26 = smov 8  }
  0x10   :  { %24 = dma.hbm_to_vmem [thread:$0]  %s262_s1, 2304, %s19_s16, [#allocation3], %s183_s25, %s183_s25, %s184_s26  }
  0x11   :  { %180 = dma.done.wait [#allocation3], 2304  }
  0x12   :  { %181 = vsyncadd [#allocation3], 4294964992  ;;  %v185_v0 = vmov 0   ;;  %v35_v1 = vld [vmem:[#allocation2] sm:$0xff]  ;;  %v36_v2 = vld [vmem:[#allocation2 + $0x8] sm:$0xff]  ;;  %vm62_vm0 = vcmask 130048  }
  0x13   :  { %66 = vmatprep.subr.bf16.mxu0 %v185_v0  ;;  %v37_v3 = vld [vmem:[#allocation2 + $0x10] sm:$0xff]  ;;  %v53_v4 = vpack.c.bf16 %v36_v2, %v35_v1  ;;  %v38_v5 = vld [vmem:[#allocation2 + $0x18] sm:$0xff]  ;;  %v39_v7 = vld [vmem:[#allocation2 + $0x20] sm:$0xff]  ;;  %vm115_vm1 = vcmask 257024   ;;  %s186_s12 = smov 64   ;;  %s187_s13 = smov 96  }
  0x14   :  { %v54_v6 = vpack.c.bf16 %v38_v5, %v37_v3  ;;  %v40_v8 = vld [vmem:[#allocation2 + $0x28] sm:$0xff]  ;;  %v32_v10 = vld [vmem:[%s261_s0 + $0x18] sm:$0xff]  ;;  %v41_v13 = vld [vmem:[#allocation2 + $0x30] sm:$0xff] }
  0x15   :  { %67 = vmatpush1.bf16.msra.mxu0 %v53_v4  ;;  %v30_v9 = vld [vmem:[%s261_s0 + $0x8] sm:$0xff]  ;;  %v55_v11 = vpack.c.bf16 %v40_v8, %v39_v7  ;;  %v42_v14 = vld [vmem:[#allocation2 + $0x38] sm:$0xff]  ;;  %v43_v16 = vld [vmem:[#allocation2 + $0x40] sm:$0xff] }
  0x16   :  { %68 = vmatprep.subr.bf16.mxu0 %v185_v0  ;;  %v34_v12 = vpack.c.bf16 %v32_v10, %v30_v9  ;;  %v56_v15 = vpack.c.bf16 %v42_v14, %v41_v13  ;;  %v44_v17 = vld [vmem:[#allocation2 + $0x48] sm:$0xff]  ;;  %v45_v19 = vld [vmem:[#allocation2 + $0x50] sm:$0xff]  ;;  %v46_v20 = vld [vmem:[#allocation2 + $0x58] sm:$0xff] }
  0x17   :  { %v57_v18 = vpack.c.bf16 %v44_v17, %v43_v16  ;;  %v58_v21 = vpack.c.bf16 %v46_v20, %v45_v19  ;;  %v47_v22 = vld [vmem:[#allocation2 + $0x60] sm:$0xff]  ;;  %v48_v23 = vld [vmem:[#allocation2 + $0x68] sm:$0xff]  ;;  %v49_v25 = vld [vmem:[#allocation2 + $0x70] sm:$0xff] }
  0x18   :  { %147 = vmatprep.mubr.msk.bf16.mxu0 %vm62_vm0, %v34_v12  ;;  %v59_v24 = vpack.c.bf16 %v48_v23, %v47_v22  ;;  %v50_v26 = vld [vmem:[#allocation2 + $0x78] sm:$0xff]  ;;  %v51_v28 = vld [vmem:[#allocation2 + $0x80] sm:$0xff]  ;;  %v52_v29 = vld [vmem:[#allocation2 + $0x88] sm:$0xff] }
  0x19   :  { %69 = vmatpush1.bf16.msra.mxu0 %v54_v6  ;;  %v60_v27 = vpack.c.bf16 %v50_v26, %v49_v25  ;;  %v61_v30 = vpack.c.bf16 %v52_v29, %v51_v28  ;;  %v29_v31 = vld [vmem:[%s261_s0] sm:$0xff]  ;;  %v31_v32 = vld [vmem:[%s261_s0 + $0x10] sm:$0xff] }
  0x1a   :  { %70 = vmatprep.subr.bf16.mxu0 %v185_v0  ;;  %v33_v33 = vpack.c.bf16 %v31_v32, %v29_v31 }
  0x1d   :  { %71 = vmatpush1.bf16.msra.mxu0 %v55_v11 }
  0x1e   :  { %72 = vmatprep.subr.bf16.mxu0 %v185_v0 }
  0x21   :  { %73 = vmatpush1.bf16.msra.mxu0 %v56_v15 }
  0x22   :  { %74 = vmatprep.subr.bf16.mxu0 %v185_v0 }
  0x25   :  { %75 = vmatpush1.bf16.msra.mxu0 %v57_v18 }
  0x26   :  { %76 = vmatprep.subr.bf16.mxu0 %v185_v0 }
  0x29   :  { %77 = vmatpush1.bf16.msra.mxu0 %v58_v21 }
  0x2a   :  { %78 = vmatprep.subr.bf16.mxu0 %v185_v0 }
  0x2d   :  { %79 = vmatpush1.bf16.msra.mxu0 %v59_v24 }
  0x2e   :  { %80 = vmatprep.subr.bf16.mxu0 %v185_v0 }
  0x31   :  { %81 = vmatpush1.bf16.msra.mxu0 %v60_v27 }
  0x32   :  { %82 = vmatprep.subr.bf16.mxu0 %v185_v0 }
  0x35   :  { %83 = vmatpush1.bf16.msra.mxu0 %v61_v30 }
  0x38   :  { %99 = vmatmul.mubr.bf16.vlgmr.msra.gmra.mrb[0].mxu0 %v33_v33 }
 0x10b   :  { %v100_v34 = vpop.f32.mrb[0].mxu0 }
 0x10c   :  { %v150_v35 = vpack.c.bf16 %v100_v34, %v100_v34  ;;  %v102_v36 = vpop.f32.mrb[1].mxu0 }
 0x10d   :  { %v103_v37 = vpop.f32.mrb[2].mxu0 }
 0x10e   :  { %116 = vst.msk [vmem:[%s263_s2] sm:$0xf] %vm115_vm1, %v150_v35  ;;  %v151_v38 = vpack.c.bf16 %v103_v37, %v103_v37  ;;  %126 = vrot.lane.b32.xlu1 %v150_v35, %s186_s12  ;;  %118 = vrot.lane.b32.xlu0 %v150_v35, %s187_s13  ;;  %v105_v39 = vpop.f32.mrb[3].mxu0 }
 0x110   :  { %117 = vst.msk [vmem:[%s263_s2 + $0x4] sm:$0xf] %vm115_vm1, %v151_v38 }
 0x112   :  { %128 = vrot.lane.b32.xlu1 %v151_v38, %s186_s12  ;;  %120 = vrot.lane.b32.xlu0 %v151_v38, %s187_s13 }
 0x180   :  { %v127_v40 = vpop.permute.xlu1 %126  ;;  %v119_v41 = vpop.permute.xlu0 %118 }
 0x181   :  { %132 = vst.msk [vmem:[%s265_s4] sm:$0xf] %vm115_vm1, %v127_v40  ;;  %124 = vst.msk [vmem:[%s264_s3] sm:$0xf] %vm115_vm1, %v119_v41 }
 0x184   :  { %v129_v42 = vpop.permute.xlu1 %128  ;;  %v121_v43 = vpop.permute.xlu0 %120 }
 0x185   :  { %133 = vst.msk [vmem:[%s265_s4 + $0x4] sm:$0xf] %vm115_vm1, %v129_v42  ;;  %125 = vst.msk [vmem:[%s264_s3 + $0x4] sm:$0xf] %vm115_vm1, %v121_v43 }
 0x186   :  { %146 = vsyncpa [#allocation3], 1 }

// kernel: relative_mha_forward.3
= control target key start
LH: loop header
LB: loop body
LE: loop exit
PB: predicated region body
PF: predicated region fallthrough
CT: control target
= control target key end

     0   :  { %11 = vsyncpa [#allocation3], 0  ;;  %s1184_s0 = inlined_call_operand.vmem [shape: bf16[2,2,8,16], index: 0, kind: input, shape index: {}]   ;;  %s1185_s1 = inlined_call_operand.vmem [shape: bf16[2,2,8,16], index: 1, kind: input, shape index: {}]   ;;  %s1186_s2 = inlined_call_operand.vmem [shape: bf16[2,2,8,16], index: 2, kind: input, shape index: {}]   ;;  %s1187_s3 = inlined_call_operand.vmem [shape: f32[8,16], index: 3, kind: input, shape index: {}]   ;;  %s1188_s4 = inlined_call_operand.vmem [shape: f32[32,144], index: 4, kind: input, shape index: {}]   ;;  %s1189_s5 = inlined_call_operand.vmem [shape: f32[1,144], index: 5, kind: input, shape index: {}]   ;;  %s1190_s6 = inlined_call_operand.hbm [shape: f32[2,8,144], index: 6, kind: output, shape index: {}]  }
   0x1   :  { %13 = vsyncpa [#allocation3 + $0x1], 0  ;;  %s1009_s21 = smov 0   ;;  %s1011_s22 = smov 0  }
   0x2   :  { %s1013_s23 = smov 0   ;;  %s1015_s24 = smov 0  }
   0x3 LB: > { %s1030_s25 = sadd.s32 4294967295, %s960_s24   ;;  %s779_s26 = sadd.s32 4294967294, %s960_s24   ;;  %s960_s24 = sphi %s1015_s24, %s1196_s24   ;;  %s956_s23 = sphi %s1013_s23, %s1195_s23   ;;  %s952_s22 = sphi %s1011_s22, %s1194_s22   ;;  %s948_s21 = sphi %s1009_s21, %s1193_s21  }
   0x4   : > { %s1034_s27 = sadd.s32 1, %s960_s24   ;;  %s167_s28 = sadd.s32 1, %s956_s23 }
   0x5   : > { %s164_s29 = ssub.s32 %s960_s24, %s1034_s27  ;;  %p177_p0 = scmp.ne.s32.totalorder %s956_s23, %s952_s22 }
   0x6   : > { %p165_p1 = scmp.eq.s32.totalorder %s164_s29, 0  ;;  %p178_p2 = scmp.eq.s32.totalorder %s1030_s25, 1 }
   0x7   : > { %p183_p3 = scmp.ne.s32.totalorder %s952_s22, %s948_s21  ;;  %p184_p4 = scmp.eq.s32.totalorder %s779_s26, 1 }
   0x8   : > { %s1045_s30 = scalar_select %p165_p1, %s956_s23, %s167_s28  }
   0x9   : > { %p1047_p5 = por %p178_p2, %p177_p0  ;;  %p1051_p6 = por %p184_p4, %p183_p3 }
   0xa   : > { %p782_p7 = scmp.ge.s32.totalorder %s960_s24, 1  ;;  %p235_p8 = scmp.lt.s32.totalorder %s960_s24, 3 }
   0xc   : > { %p236_p9 = pnand %p782_p7, %p235_p8 }
   0xd   : > { %p275_p10 = scmp.lt.s32.totalorder (!%p236_p9), %s1030_s25, 1  ;;  %v962_v0 = vmov (!%p236_p9), 0.0   ;;  %vm963_vm0 = vmmov (!%p236_p9), 0   ;;  %v301_v4 = vld [vmem:[%s1187_s3] sm:$0xff] (!%p236_p9)  ;;  %vm304_vm1 = vcmask (!%p236_p9), 130048   ;;  %s964_s19 = smov (!%p236_p9), 120   ;;  %v397_v21 = vlaneseq (!%p236_p9) }
   0xe   : > { %239 = sbr.rel (%p236_p9) target bundleno = 1485 (0x5cd), region = 44  ;;  %822 = vmatprep.subr.bf16.mxu1 (!%p236_p9), %v962_v0  ;;  %816 = vmatprep.subr.bf16.mxu0 (!%p236_p9), %v962_v0  ;;  %s965_s20 = smov (!%p236_p9), 119   ;;  %vm416_vm2 = vcmask (!%p236_p9), 56320   ;;  %vm445_vm4 = vcmask (!%p236_p9), 48128   ;;  %vm469_vm6 = vcmask (!%p236_p9), 31744   ;;  %vm486_vm9 = vcmask (!%p236_p9), 64512  }
   0xf   : > { %824 = vmatprep.mubr.msk.bf16.mxu1 (!%p236_p9), %vm963_vm0, %v962_v0  ;;  %818 = vmatprep.mubr.msk.bf16.mxu0 (!%p236_p9), %vm963_vm0, %v962_v0  ;;  %s966_s26 = smov (!%p236_p9), 127   ;;  %v1090_v22 = vshrl.u32 (!%p236_p9), %v397_v21, 7  ;;  %s967_s28 = smov (!%p236_p9), 126   ;;  %v400_v47 = vand.u32 (!%p236_p9), 127, %v397_v21  ;;  %vm514_vm10 = vcmask (!%p236_p9), 1043456   ;;  %v613_v21 = vld [vmem:[%s1188_s4 + $0x18] sm:$0xff] (!%p236_p9) }
  0x10   : > { %s968_s29 = smov (!%p236_p9), 6   ;;  %s970_s11 = smov (!%p236_p9), 124   ;;  %vm634_vm11 = vcmask (!%p236_p9), 261120  }
  0x11   : > { %v401_v23 = vsub.s32 (!%p236_p9), 7, %v1090_v22  ;;  %vm479_vm8 = vcmp.le.s32.totalorder (!%p236_p9), %v400_v47, %v1090_v22  ;;  %s972_s15 = smov (!%p236_p9), 16   ;;  %s272_s16 = sand.u32 (!%p236_p9), 1, %s952_s22   ;;  %v630_v47 = vsub.s32 (!%p236_p9), 1, %v1090_v22 }
  0x12   : > { %s783_s17 = sshll.u32 (!%p236_p9), %s272_s16, 4 }
  0x13   : > { %v419_v24 = vand.u32 (!%p236_p9), 1, %v401_v23  ;;  %v448_v35 = vshra.s32 (!%p236_p9), %v401_v23, 1  ;;  %v472_v45 = vshra.s32 (!%p236_p9), %v401_v23, 2  ;;  %v610_v23 = vld [vmem:[%s1188_s4] sm:$0xff] (!%p236_p9) }
  0x15   : > { %s276_s9 = scalar_select %p275_p10, %s1030_s25, 1  ;;  %vm420_vm3 = vcmp.eq.s32.totalorder %v419_v24, 1  ;;  %v449_v36 = vand.u32 1, %v448_v35  ;;  %v473_v46 = vand.u32 1, %v472_v45  ;;  %v626_v45 = vsub.s32 0, %v1090_v22 }
  0x17   : > { %s1061_s10 = sshll.u32 %s276_s9, 3  ;;  %vm450_vm5 = vcmp.eq.s32.totalorder %v449_v36, 1  ;;  %s969_s9 = smov 4   ;;  %vm474_vm7 = vcmp.eq.s32.totalorder %v473_v46, 1  ;;  %v622_v46 = vld [vmem:[%s1189_s5] sm:$0x3] }
  0x18   : > { %s284_s13 = scalar_lea.vmem %s1185_s1, %s1061_s10  ;;  %s279_s18 = scalar_lea.vmem %s1184_s0, %s1061_s10 }
  0x19   : > { %v805_v1 = vld [vmem:[%s284_s13] sm:$0xff]   ;;  %s289_s14 = scalar_lea.vmem %s1186_s2, %s1061_s10  ;;  %s973_s13 = smov [#allocation2]  }
  0x1a   : > { %v807_v2 = vunpack.c.h.bf16 %v805_v1  ;;  %v806_v3 = vunpack.c.l.bf16 %v805_v1  ;;  %v292_v11 = vld [vmem:[%s279_s18 + $0x4] sm:$0xf]  ;;  %v291_v12 = vld [vmem:[%s279_s18] sm:$0xf] }
  0x1c   : > { %v300_v5 = vmul.f32 0.25, %v807_v2  ;;  %v299_v6 = vmul.f32 0.25, %v806_v3 }
  0x1e   : > { %v303_v7 = vpack.c.bf16 %v301_v4, %v300_v5  ;;  %v302_v8 = vpack.c.bf16 %v301_v4, %v299_v6 }
  0x20   : > { %v355_v9 = vsel %vm304_vm1, %v303_v7, 0  ;;  %v309_v10 = vsel %vm304_vm1, %v302_v8, 0  ;;  %v296_v8 = vld [vmem:[%s289_s14 + $0x4] sm:$0xf] }
  0x21   : > { %823 = vmatpush3.bf16.xpose.msra.mxu1 %v355_v9  ;;  %817 = vmatpush3.bf16.xpose.msra.mxu0 %v309_v10  ;;  %v562_v9 = vsel %vm514_vm10, %v296_v8, 0  ;;  %v295_v10 = vld [vmem:[%s289_s14] sm:$0xf]  ;;  %s902_s14 = sshll.u32 %s973_s13, 4  ;;  %s903_s14 = int_to_ptr.vmem [resolvable:$false] %s902_s14 }
  0x22   : > { %834 = vmatprep.subr.bf16.mxu1 %v962_v0  ;;  %828 = vmatprep.subr.bf16.mxu0 %v962_v0  ;;  %s904_s10 = scalar_lea.vmem %s903_s14, 512 }
  0x28   : > { %825 = vmatmul.mubr.msk.bf16.vlgmr.msra.gmra.mrb[0].mxu1 %vm304_vm1, %v292_v11  ;;  %819 = vmatmul.mubr.msk.bf16.vlgmr.msra.gmra.mrb[0].mxu0 %vm304_vm1, %v291_v12  ;;  %v516_v11 = vsel %vm514_vm10, %v295_v10, 0 }
  0x29   : > { %836 = vmatprep.mubr.msk.bf16.mxu1 %vm963_vm0, %v962_v0  ;;  %830 = vmatprep.mubr.msk.bf16.mxu0 %vm963_vm0, %v962_v0 }
  0x2a   : > { %835 = vmatpush3.bf16.msra.mxu1 %v562_v9  ;;  %829 = vmatpush3.bf16.msra.mxu0 %v516_v11 }
  0xfb   : > { %v1080_v13 = vpop.f32.mrb[0].mxu1  ;;  %v1082_v14 = vpop.f32.mrb[0].mxu0 }
  0xfc   : > { %425 = vrot.lane.b32.xlu1 %v1080_v13, %s964_s19  ;;  %406 = vrot.lane.b32.xlu0 %v1080_v13, %s965_s20  ;;  %v826_v15 = vpop.f32.mrb[1].mxu1  ;;  %v820_v16 = vpop.f32.mrb[1].mxu0 }
  0xfd   : > { %v394_v17 = vpop.f32.mrb[2].mxu1  ;;  %v348_v18 = vpop.f32.mrb[2].mxu0 }
  0xfe   : > { %v827_v19 = vpop.f32.mrb[3].mxu1  ;;  %v821_v20 = vpop.f32.mrb[3].mxu0 }
  0xff   : > { %v611_v20 = vld [vmem:[%s1188_s4 + $0x8] sm:$0xff] }
 0x100   : > { %412 = vrot.lane.b32.xlu0 %v1080_v13, %s966_s26  ;;  %404 = vrot.lane.b32.xlu1 %v1082_v14, %s965_s20  ;;  %v619_v24 = vpack.c.bf16 %v613_v21, %v611_v20  ;;  %s803_s20 = sshll.u32 %s1030_s25, 8  ;;  %s682_s25 = scalar_lea.sflag [#allocation3], %s272_s16 }
 0x102   : > { %638 = vmatprep.subr.bf16.mxu0 %v619_v24 }
 0x104   : > { %410 = vrot.lane.b32.xlu0 %v1082_v14, %s966_s26  ;;  %423 = vrot.lane.b32.xlu1 %v1082_v14, %s964_s19  ;;  %s274_s26 = scalar_lea.vmem [#allocation2], %s783_s17 }
 0x16e   : > { %v426_v25 = vpop.permute.xlu1 %425  ;;  %v407_v26 = vpop.permute.xlu0 %406 }
 0x172   : > { %v413_v27 = vpop.permute.xlu0 %412  ;;  %v405_v28 = vpop.permute.xlu1 %404 }
 0x173   : > { %v418_v29 = vsel %vm416_vm2, %v407_v26, %v413_v27  ;;  %v615_v26 = vld [vmem:[%s1188_s4 + $0x28] sm:$0xff]  ;;  %v617_v27 = vld [vmem:[%s1188_s4 + $0x38] sm:$0xff] }
 0x174   : > { %v430_v30 = vsel %vm420_vm3, %v418_v29, %v426_v25  ;;  %v612_v25 = vld [vmem:[%s1188_s4 + $0x10] sm:$0xff]  ;;  %v621_v29 = vpack.c.bf16 %v617_v27, %v615_v26 }
 0x175   : > { %435 = vrot.lane.b32.xlu0 %v430_v30, %s967_s28  ;;  %441 = vrot.lane.b32.xlu1 %v430_v30, %s968_s29 }
 0x176   : > { %v411_v31 = vpop.permute.xlu0 %410  ;;  %v424_v32 = vpop.permute.xlu1 %423 }
 0x177   : > { %v417_v33 = vsel %vm416_vm2, %v405_v28, %v411_v31  ;;  %v618_v28 = vpack.c.bf16 %v612_v25, %v610_v23  ;;  %v616_v31 = vld [vmem:[%s1188_s4 + $0x30] sm:$0xff] }
 0x178   : > { %v429_v34 = vsel %vm420_vm3, %v417_v33, %v424_v32  ;;  %v971_v33 = vmov 0  }
 0x179   : > { %439 = vrot.lane.b32.xlu1 %v429_v34, %s968_s29  ;;  %433 = vrot.lane.b32.xlu0 %v429_v34, %s967_s28  ;;  %s696_s28 = sshll.u32 %s274_s26, 4  ;;  %s1143_s28 = int_to_ptr.vmem [resolvable:$true] %s696_s28 }
 0x17a   : > { %s898_s12 = scalar_lea.vmem %s1143_s28, 256  ;;  %p905_p0 = scmp.lt.s32.totalorder %s1143_s28, %s903_s14 }
 0x17b   : > { %p899_p11 = scmp.ne.s32.totalorder %s1143_s28, %s898_s12  ;;  %p906_p1 = scmp.lt.s32.totalorder %s904_s10, %s898_s12 }
 0x17d   : > { %p900_p12 = pnand %p899_p11, %p1047_p5  ;;  %p907_p2 = por %p906_p1, %p905_p0 }
 0x17f   : > { %p901_p13 = pneg %p900_p12 }
 0x181   : > { %p908_p3 = pnand %p907_p2, %p901_p13 }
 0x1e7   : > { %v436_v37 = vpop.permute.xlu0 %435  ;;  %v442_v38 = vpop.permute.xlu1 %441 }
 0x1e8   : > { %v447_v39 = vsel %vm445_vm4, %v436_v37, %v442_v38 }
 0x1e9   : > { %v454_v40 = vsel %vm450_vm5, %v447_v39, %v430_v30  ;;  %v614_v30 = vld [vmem:[%s1188_s4 + $0x20] sm:$0xff] }
 0x1ea   : > { %465 = vrot.lane.b32.xlu1 %v454_v40, %s969_s9  ;;  %459 = vrot.lane.b32.xlu0 %v454_v40, %s970_s11  ;;  %v620_v32 = vpack.c.bf16 %v616_v31, %v614_v30 }
 0x1eb   : > { %v434_v41 = vpop.permute.xlu0 %433  ;;  %v440_v42 = vpop.permute.xlu1 %439 }
 0x1ec   : > { %v446_v43 = vsel %vm445_vm4, %v434_v41, %v440_v42 }
 0x1ed   : > { %v453_v44 = vsel %vm450_vm5, %v446_v43, %v429_v34 }
 0x1ee   : > { %463 = vrot.lane.b32.xlu1 %v453_v44, %s969_s9  ;;  %457 = vrot.lane.b32.xlu0 %v453_v44, %s970_s11  ;;  %s1141_s11 = scalar_lea.hbm %s1190_s6, %s803_s20 }
 0x25c   : > { %v460_v48 = vpop.permute.xlu0 %459  ;;  %v466_v49 = vpop.permute.xlu1 %465 }
 0x25d   : > { %v471_v50 = vsel %vm469_vm6, %v460_v48, %v466_v49  ;;  %v627_v48 = vrot.slane %v622_v46, %v626_v45  ;;  %v631_v49 = vrot.slane %v622_v46, %v630_v47 }
 0x25e   : > { %v478_v51 = vsel %vm474_vm7, %v471_v50, %v454_v40 }
 0x25f   : > { %v481_v52 = vadd.f32 %v478_v51, %v1080_v13 }
 0x260   : > { %v458_v53 = vpop.permute.xlu0 %457  ;;  %v464_v54 = vpop.permute.xlu1 %463 }
 0x261   : > { %v470_v55 = vsel %vm469_vm6, %v458_v53, %v464_v54  ;;  %v485_v56 = vsel %vm479_vm8, %v481_v52, -inf }
 0x262   : > { %v477_v57 = vsel %vm474_vm7, %v470_v55, %v453_v44  ;;  %v490_v58 = vsel %vm486_vm9, %v485_v56, -inf }
 0x263   : > { %491 = vmax.xlane.f32.xlu0 %v490_v58  ;;  %v480_v59 = vadd.f32 %v477_v57, %v1082_v14 }
 0x265   : > { %v484_v60 = vsel %vm479_vm8, %v480_v59, -inf }
 0x266   : > { %v487_v61 = vsel %vm486_vm9, %v484_v60, -inf }
 0x267   : > { %488 = vmax.xlane.f32.xlu1 %v487_v61 }
 0x2f0   : > { %v492_v62 = vpop.xlane.xlu0 %491 }
 0x2f1   : > { %v494_v63 = vsub.f32 %v485_v56, %v492_v62 }
 0x2f3   : > { %v497_v0 = vmul.f32 1.442695, %v494_v63 }
 0x2f4   : > { %v489_v1 = vpop.xlane.xlu1 %488 }
 0x2f5   : > { %890 = vpow2.f32 %v497_v0  ;;  %v493_v2 = vsub.f32 %v484_v60, %v489_v1 }
 0x2f7   : > { %v495_v3 = vmul.f32 1.442695, %v493_v2 }
 0x2f9   : > { %892 = vpow2.f32 %v495_v3 }
 0x2ff   : > { %v891_v4 = vpop.eup %890 }
 0x300   : > { %v502_v5 = vsel %vm486_vm9, %v891_v4, 0.0 }
 0x301   : > { %503 = vadd.xlane.f32.xlu0 %v502_v5 }
 0x303   : > { %v893_v6 = vpop.eup %892 }
 0x304   : > { %v499_v7 = vsel %vm486_vm9, %v893_v6, 0.0 }
 0x305   : > { %500 = vadd.xlane.f32.xlu0 %v499_v7 }
 0x38e   : > { %v504_v12 = vpop.xlane.xlu0 %503 }
 0x38f   : > { %894 = vrcp.f32 %v504_v12 }
 0x392   : > { %v501_v13 = vpop.xlane.xlu0 %500 }
 0x393   : > { %896 = vrcp.f32 %v501_v13 }
 0x399   : > { %v895_v14 = vpop.eup %894 }
 0x39a   : > { %v508_v15 = vmul.f32 %v895_v14, %v891_v4 }
 0x39c   : > { %v510_v16 = vpack.c.bf16 %v508_v15, %v508_v15 }
 0x39d   : > { %v897_v17 = vpop.eup %896 }
 0x39e   : > { %v507_v18 = vmul.f32 %v897_v17, %v893_v6  ;;  %837 = vmatmul.mubr.msk.bf16.vlgmr.msra.gmra.mrb[4].mxu1 %vm486_vm9, %v510_v16 }
 0x3a0   : > { %v509_v19 = vpack.c.bf16 %v507_v18, %v507_v18 }
 0x3a2   : > { %831 = vmatmul.mubr.msk.bf16.vlgmr.msra.gmra.mrb[4].mxu0 %vm486_vm9, %v509_v19 }
 0x3a3   : > { %639 = vmatpush1.bf16.msra.mxu0 %v618_v28  ;;  %670 = vmatprep.mubr.bf16.mxu0 %v971_v33 }
 0x3a4   : > { %640 = vmatprep.subr.bf16.mxu0 %v621_v29 }
 0x3a7   : > { %641 = vmatpush1.bf16.msra.mxu0 %v620_v32 }
 0x471   : > { %v598_v34 = vpop.f32.mrb[4].mxu1 }
 0x472   : > { %v838_v35 = vpop.f32.mrb[5].mxu1  ;;  %605 = vrot.lane.b32.xlu1 %v598_v34, %s972_s15 }
 0x473   : > { %v601_v36 = vpop.f32.mrb[6].mxu1 }
 0x474   : > { %v839_v37 = vpop.f32.mrb[7].mxu1 }
 0x475   : > { %v552_v38 = vpop.f32.mrb[4].mxu0 }
 0x476   : > { %v832_v39 = vpop.f32.mrb[5].mxu0 }
 0x477   : > { %v555_v40 = vpop.f32.mrb[6].mxu0 }
 0x478   : > { %v833_v41 = vpop.f32.mrb[7].mxu0 }
 0x4e4   : > { %v606_v42 = vpop.permute.xlu1 %605 }
 0x4e5   : > { %v608_v43 = vsel %vm304_vm1, %v552_v38, %v606_v42 }
 0x4e6   : > { %v609_v44 = vpack.c.bf16 %v608_v43, %v608_v43 }
 0x4e8   : > { %794 = vmatmul.mubr.msk.bf16.vlgmr.msra.gmra.mrb[8].mxu0 %vm634_vm11, %v609_v44 }
 0x5bb   : > { %v672_v50 = vpop.f32.mrb[8].mxu0 }
 0x5bc   : > { %v673_v51 = vadd.f32 %v672_v50, %v627_v48  ;;  %v674_v52 = vpop.f32.mrb[9].mxu0 }
 0x5bd   : > { %v675_v53 = vadd.f32 %v674_v52, %v631_v49  ;;  %v676_v54 = vpop.f32.mrb[10].mxu0 }
 0x5be   : > { %679 = vst [vmem:[%s274_s26] sm:$0xff] %v673_v51  ;;  %v677_v22 = vpop.f32.mrb[11].mxu0 }
 0x5bf   : > { %680 = vst.msk [vmem:[%s274_s26 + $0x8] sm:$0xff] %vm304_vm1, %v675_v53 }
 0x5c0   : > { %911 = shalt.err (!%p908_p3)
}
 0x5c1   : > { %s912_s15 = scalar_lea.hbm %s1141_s11, 256  ;;  %s916_s18 = scalar_lea.hbm %s1190_s6, 512 }
 0x5c2   : > { %p913_p4 = scmp.ne.s32.totalorder %s1141_s11, %s912_s15  ;;  %p917_p9 = scmp.lt.u32.totalorder %s1141_s11, %s1190_s6 }
 0x5c3   : > { %p918_p10 = scmp.lt.u32.totalorder %s916_s18, %s912_s15  ;;  %p920_p12 = scmp.lt.u32.totalorder %s912_s15, %s1141_s11 }
 0x5c4   : > { %p914_p7 = pnand %p913_p4, %p1047_p5 }
 0x5c5   : > { %p919_p11 = por %p918_p10, %p917_p9 }
 0x5c6   : > { %p915_p8 = pneg %p914_p7 }
 0x5c7   : > { %p921_p13 = por %p920_p12, %p919_p11 }
 0x5c9   : > { %p922_p0 = pnand %p921_p13, %p915_p8 }
 0x5cb   : > { %925 = shalt.err (!%p922_p0)
}
 0x5cc   : > { %840 = dma.vmem_to_hbm [thread:$0]  (%p1047_p5), %s1143_s28, 256, %s1141_s11, %s682_s25  }
 0x5cd PF: > { %p846_p1 = scmp.ge.s32.totalorder %s960_s24, 2  ;;  %s708_s26 = sand.u32 1, %s948_s21  }
 0x5ce   : > { %s709_s29 = scalar_lea.sflag [#allocation3], %s708_s26 }
 0x5cf   : > { %p843_p2 = pnand %p846_p1, %p1051_p6 }
 0x5d1   : > { %943 = dma.done.wait (!%p843_p2), %s709_s29, 256  }
 0x5d2   : > { %945 = vsyncadd (!%p843_p2), %s709_s29, 4294967040  ;;  %p16_p3 = scmp.ge.s32.totalorder %s1034_s27, 4   ;;  %s1193_s21 = smov %s952_s22 }
 0x5d3   : > { %s1194_s22 = smov %s956_s23  ;;  %s1195_s23 = smov %s1045_s30 }
 0x5d4   : > { %s1196_s24 = smov %s1034_s27  ;;  %18 = sbr.rel (!%p16_p3) target bundleno = 3 (0x3), region = 85 }
 0x5db   :  { %714 = vsyncpa [#allocation3], 1 }
 0x5dc   :  { %716 = vsyncpa [#allocation3 + $0x1], 1 }

</bundles_post_ra>
